<compile_context>
chip_gen: v5e
topology: v5e:2x2
jax: 0.10.0
libtpu: 0.0.40
codegen_flags: <defaults>
</compile_context>

<pallas_src>
import math

import jax
import jax.numpy as jnp
from jax.experimental import pallas as pl
from jax.experimental.pallas import tpu as pltpu


# ---------------------------------------------------------------------------
# Buffer construction (mirrors nn.Module.__init__; not learned, plain JAX)
# ---------------------------------------------------------------------------
def make_sinusoidal_pe(d_model: int, max_len: int = 1024) -> jnp.ndarray:
    """Returns pe with shape (1, max_len, d_model), float32."""
    position = jnp.arange(0, max_len, dtype=jnp.float32)[:, None]             # (L, 1)
    div_term = jnp.exp(
        jnp.arange(0, d_model, 2, dtype=jnp.float32)
        * (-math.log(10000.0) / d_model)
    )                                                                          # (ceil(D/2),)
    angles = position * div_term                                               # (L, ceil(D/2))
    pe = jnp.zeros((max_len, d_model), dtype=jnp.float32)
    pe = pe.at[:, 0::2].set(jnp.sin(angles))
    pe = pe.at[:, 1::2].set(jnp.cos(angles)[:, : d_model // 2])                # odd-D safe
    return pe[None, :, :]                                                      # (1, L, D)


# ---------------------------------------------------------------------------
# Pallas kernel: elementwise broadcast add of the positional encoding
# ---------------------------------------------------------------------------
def _add_pe_kernel(x_ref, pe_ref, o_ref):
    # x_ref/o_ref: (bt, ts, lane) tiles; pe_ref: (1, ts, lane), shared across
    # the batch block (and revisited across the inner batch grid axis).
    # The add runs in the promoted dtype, matching PyTorch's type promotion.
    o_ref[...] = (x_ref[...] + pe_ref[...]).astype(o_ref.dtype)


# ---------------------------------------------------------------------------
# Tiling helpers
# ---------------------------------------------------------------------------
_TARGET_TILE_BYTES = 4 * 1024 * 1024   # ~4 MiB x-tile: ~85-86% of HBM roofline


def _vmem_limit_bytes() -> int:
    # 48 MiB is safe on every generation (v7x has only 64 MiB physical VMEM per
    # TensorCore; v5e/v6e have 128 MiB).  If the runtime exposes the real
    # capacity, use 3/4 of it capped at 64 MiB (=> 64 MiB on v5e/v6e, 48 on v7x).
    limit = 48 * 1024 * 1024
    try:
        cap = getattr(pltpu.get_tpu_info(), "vmem_capacity_bytes", None)
        if cap:
            limit = min(64 * 1024 * 1024, (int(cap) * 3) // 4)
    except Exception:
        pass
    return max(limit, 32 * 1024 * 1024)


def _largest_divisor_leq(n: int, cap: int) -> int:
    cap = max(1, min(n, cap))
    for d in range(cap, 0, -1):
        if n % d == 0:
            return d
    return 1


# ---------------------------------------------------------------------------
# Forward wrapper
# ---------------------------------------------------------------------------
def sinusoidal_positional_encoding(
    x: jnp.ndarray, pe: jnp.ndarray, *, donate_x: bool = False
) -> jnp.ndarray:
    """x: (B, S, D); pe: (1, max_len, D) float32. Returns x + pe[:, :S]."""
    B, S, D = x.shape
    _, max_len, D_pe = pe.shape
    if D != D_pe:
        raise ValueError(f"d_model mismatch: x has {D}, pe has {D_pe}")
    if S > max_len:
        raise ValueError(f"seq_len {S} exceeds max_len {max_len}")

    out_dtype = jnp.promote_types(x.dtype, pe.dtype)   # PyTorch promotion semantics
    x_item = jnp.dtype(x.dtype).itemsize
    pe_item = jnp.dtype(pe.dtype).itemsize
    out_item = jnp.dtype(out_dtype).itemsize

    # Lane-dense view without any padding pass: fold rows into the lane dim via
    # a free contiguous reshape when divisibility allows; otherwise keep the
    # native layout with a full-extent D block (masked vst only, no extra bytes).
    fold = (S * D) % 128 == 0 and (max_len * D) % 128 == 0
    if fold:
        lane = 128
        rows = (S * D) // 128
        pe_rows = (max_len * D) // 128
        x_in = x.reshape(B, rows, lane)          # metadata-only
        pe_in = pe.reshape(1, pe_rows, lane)     # metadata-only
    else:
        lane = D
        rows = S
        pe_rows = max_len
        x_in, pe_in = x, pe

    # Sublane packing multiple for the second-to-last block dim (8 f32 / 16 bf16 / 32 i8).
    sub = max(8, 32 // min(x_item, pe_item, out_item))

    vmem_limit = _vmem_limit_bytes()
    ws_budget = vmem_limit // 2   # headroom for Mosaic internals

    # ---- sequence tile -----------------------------------------------------
    if rows < sub:
        # Tiny sequence: a single full-extent block.  Slice pe so the same
        # full-dim block shape is legal for it too (copy is negligible here).
        ts = rows
        pe_in = pe_in[:, :rows]
        pe_rows = rows
        can_shrink_ts = False
    else:
        ts_cap = max(sub, _TARGET_TILE_BYTES // (lane * x_item))
        ts = max(sub, (min(ts_cap, rows) // sub) * sub)
        can_shrink_ts = True

    num_s = pl.cdiv(rows, ts)

    # ---- batch tile: widen when one sequence tile already covers everything -
    bt = 1
    if num_s == 1:
        per_batch_bytes = max(1, ts * lane * x_item)
        want = max(1, _TARGET_TILE_BYTES // per_batch_bytes)
        bt = _largest_divisor_leq(B, want)

    # ---- fit the resident working set into the VMEM budget ------------------
    def _ws_bytes(bt_, ts_):
        # x and out double-buffered per batch-tile; pe double-buffered once.
        return 2 * ts_ * lane * (bt_ * (x_item + out_item) + pe_item)

    while _ws_bytes(bt, ts) > ws_budget:
        if bt > 1:
            bt = _largest_divisor_leq(B, bt // 2)
        elif can_shrink_ts and ts > sub:
            ts = max(sub, ((ts // 2) // sub) * sub)
        else:
            break
    num_s = pl.cdiv(rows, ts)
    num_b = B // bt

    in_out_aliases = {0: 0} if (donate_x and out_dtype == x.dtype) else {}

    out = pl.pallas_call(
        _add_pe_kernel,
        out_shape=jax.ShapeDtypeStruct((B, rows, lane), out_dtype),
        grid_spec=pltpu.PrefetchScalarGridSpec(
            num_scalar_prefetch=0,
            # batch innermost: pe's block index is constant across the inner b
            # loop, so each pe tile is DMA'd from HBM once per s-tile.
            grid=(num_s, num_b),
            in_specs=[
                pl.BlockSpec((bt, ts, lane), lambda s, b: (b, s, 0)),   # x tile
                pl.BlockSpec((1, ts, lane), lambda s, b: (0, s, 0)),    # pe tile (batch-invariant)
            ],
            out_specs=pl.BlockSpec((bt, ts, lane), lambda s, b: (b, s, 0)),
        ),
        input_output_aliases=in_out_aliases,
        compiler_params=pltpu.CompilerParams(
            dimension_semantics=("parallel", "parallel"),
            vmem_limit_bytes=vmem_limit,
        ),
    )(x_in, pe_in)

    return out.reshape(B, S, D) if fold else out


# ---------------------------------------------------------------------------
# Demo / correctness check
# ---------------------------------------------------------------------------
if __name__ == "__main__":
    batch, seq_len, d_model, max_len = 2, 8, 32, 64

    key = jax.random.PRNGKey(0)
    x = jax.random.normal(key, (batch, seq_len, d_model), dtype=jnp.float32)

    pe = make_sinusoidal_pe(d_model, max_len)

    # Reference (plain JAX, mirrors the PyTorch forward exactly)
    ref = x + pe[:, :seq_len]

    out = sinusoidal_positional_encoding(x, pe)
    out = jax.block_until_ready(out)

    assert out.shape == (batch, seq_len, d_model)
    assert out.dtype == ref.dtype
    assert jnp.allclose(out, ref, atol=1e-6), "mismatch vs reference"

    print("KERNEL_OK")
</pallas_src>

<mosaic_0001>
module attributes {stable_mosaic.version = 11 : i64} {
  func.func @_add_pe_kernel(%arg0: i32, %arg1: i32, %arg2: memref<2x2x128xf32, #tpu.memory_space<vmem>>, %arg3: memref<1x2x128xf32, #tpu.memory_space<vmem>>, %arg4: memref<2x2x128xf32, #tpu.memory_space<vmem>>) attributes {dimension_semantics = [#tpu.dimension_semantics<parallel>, #tpu.dimension_semantics<parallel>], iteration_bounds = array<i64: 1, 1>, scalar_prefetch = 0 : i64, scratch_operands = 0 : i64, tpu.core_type = #tpu.core_type<tc>, window_params = [{transform_indices = @transform_0, window_bounds = array<i64: 2, 2, 128>}, {transform_indices = @transform_1, window_bounds = array<i64: 1, 2, 128>}, {transform_indices = @transform_2, window_bounds = array<i64: 2, 2, 128>}]} {
    %c0 = arith.constant 0 : index
    %c0_0 = arith.constant 0 : index
    %c0_1 = arith.constant 0 : index
    %0 = vector.load %arg2[%c0, %c0_0, %c0_1] : memref<2x2x128xf32, #tpu.memory_space<vmem>>, vector<2x2x128xf32>
    %c0_2 = arith.constant 0 : index
    %c0_3 = arith.constant 0 : index
    %c0_4 = arith.constant 0 : index
    %1 = vector.load %arg3[%c0_2, %c0_3, %c0_4] : memref<1x2x128xf32, #tpu.memory_space<vmem>>, vector<1x2x128xf32>
    %2 = vector.broadcast %1 : vector<1x2x128xf32> to vector<2x2x128xf32>
    %3 = arith.addf %0, %2 : vector<2x2x128xf32>
    %c0_5 = arith.constant 0 : index
    %c0_6 = arith.constant 0 : index
    %c0_7 = arith.constant 0 : index
    %4 = vector.load %arg4[%c0_5, %c0_6, %c0_7] : memref<2x2x128xf32, #tpu.memory_space<vmem>>, vector<2x2x128xf32>
    tpu.vector_store %arg4[%c0_5, %c0_6, %c0_7], %3 {strides = array<i32>} : memref<2x2x128xf32, #tpu.memory_space<vmem>>, vector<2x2x128xf32>,
    return
  }
  func.func @transform_0(%arg0: i32, %arg1: i32) -> (i32, i32, i32) {
    %c0_i32 = arith.constant 0 : i32
    %c0_i32_0 = arith.constant 0 : i32
    return %arg1, %arg0, %c0_i32 : i32, i32, i32
  }
  func.func @transform_1(%arg0: i32, %arg1: i32) -> (i32, i32, i32) {
    %c0_i32 = arith.constant 0 : i32
    %c0_i32_0 = arith.constant 0 : i32
    %c0_i32_1 = arith.constant 0 : i32
    return %c0_i32, %arg0, %c0_i32_0 : i32, i32, i32
  }
  func.func @transform_2(%arg0: i32, %arg1: i32) -> (i32, i32, i32) {
    %c0_i32 = arith.constant 0 : i32
    %c0_i32_0 = arith.constant 0 : i32
    return %arg1, %arg0, %c0_i32 : i32, i32, i32
  }
}

</mosaic_0001>

<bundles_post_ra>
// kernel: tpu_custom_call.1
= control target key start
LH: loop header
LB: loop body
LE: loop exit
PB: predicated region body
PF: predicated region fallthrough
CT: control target
= control target key end

     0   :  { %7 = vsyncpa [#allocation3], 0  ;;  %s181_s0 = inlined_call_operand.hbm [shape: f32[2,2,128], index: 0, kind: input, shape index: {}]   ;;  %s182_s1 = inlined_call_operand.hbm [shape: f32[1,2,128], index: 1, kind: input, shape index: {}]   ;;  %s183_s2 = inlined_call_operand.hbm [shape: f32[2,2,128], index: 2, kind: output, shape index: {}]  }
   0x1   :  { %8 = vsyncpa [#allocation6], 0 }
   0x2   :  { %9 = vsyncpa [#allocation4], 0  ;;  %s14_s11 = sshll.u32 %s181_s0, 4  ;;  %s152_s12 = smov [#allocation2]   ;;  %s15_s11 = int_to_ptr.hbm [resolvable:$true] %s14_s11 }
   0x3   :  { %s16_s13 = sshll.u32 %s152_s12, 4  ;;  %s28_s16 = sshll.u32 %s182_s1, 4  ;;  %s17_s13 = int_to_ptr.vmem [resolvable:$true] %s16_s13  ;;  %s29_s16 = int_to_ptr.hbm [resolvable:$true] %s28_s16 }
   0x4   :  { %s153_s17 = smov 32   ;;  %s154_s18 = smov 2  }
   0x5   :  { %22 = dma.hbm_to_vmem [thread:$0]  %s15_s11, 64, %s17_s13, [#allocation3], %s153_s17, %s153_s17, %s154_s18  }
   0x6   :  { %s155_s19 = smov [#allocation5]  }
   0x7   :  { %s30_s20 = sshll.u32 %s155_s19, 4  ;;  %s31_s20 = int_to_ptr.vmem [resolvable:$true] %s30_s20 }
   0x8   :  { %33 = dma.hbm_to_vmem [thread:$0]  %s29_s16, 32, %s31_s20, [#allocation6]  }
   0x9   :  { %146 = dma.done.wait [#allocation3], 64  }
   0xa   :  { %147 = vsyncadd [#allocation3], 4294967232 }
   0xb   :  { %148 = dma.done.wait [#allocation6], 32  }
   0xc   :  { %149 = vsyncadd [#allocation6], 4294967264  ;;  %s156_s0 = smov [#allocation7]   ;;  %s55_s24 = sshll.u32 %s183_s2, 4  ;;  %v42_v0 = vld [vmem:[#allocation2] sm:$0x3]  ;;  %s56_s24 = int_to_ptr.hbm [resolvable:$true] %s55_s24 }
   0xd   :  { %s53_s21 = sshll.u32 %s156_s0, 4  ;;  %v44_v1 = vld [vmem:[#allocation5] sm:$0x3]  ;;  %v43_v2 = vld [vmem:[#allocation2 + $0x2] sm:$0x3]  ;;  %s54_s21 = int_to_ptr.vmem [resolvable:$true] %s53_s21 }
   0xe   :  { %v45_v3 = vadd.f32 %v44_v1, %v42_v0  ;;  %v46_v4 = vadd.f32 %v44_v1, %v43_v2 }
  0x10   :  { %47 = vst [vmem:[#allocation7] sm:$0x3] %v45_v3 }
  0x11   :  { %48 = vst [vmem:[#allocation7 + $0x2] sm:$0x3] %v46_v4 }
  0x12   :  { %61 = dma.vmem_to_hbm [thread:$0]  %s54_s21, 64, %s56_s24, [#allocation4], %s153_s17, %s153_s17, %s154_s18  }
  0x13   :  { %150 = dma.done.wait [#allocation4], 64  }
  0x14   :  { %151 = vsyncadd [#allocation4], 4294967232 }
  0x15   :  { %66 = vsyncpa [#allocation3], 1 }
  0x16   :  { %67 = vsyncpa [#allocation6], 1 }
  0x17   :  { %68 = vsyncpa [#allocation4], 1 }

</bundles_post_ra>
